<compile_context>
chip_gen: v7x
topology: tpu7x:2x2x1
jax: 0.10.0
libtpu: 0.0.40
codegen_flags: <defaults>
</compile_context>

<pallas_src>
import jax
import jax.numpy as jnp
from jax.experimental import pallas as pl
from jax.experimental.pallas import tpu as pltpu


def mlp_kernel(x_ref, w1_ref, b1_ref, w2_ref, b2_ref, o_ref):
    # x_ref: (TB, IN) f32 | w1_ref: (IN, HID) bf16 | b1_ref: (1, HID) f32
    # w2_ref: (HID, OUT) bf16 | b2_ref: (1, OUT) f32 | o_ref: (TB, OUT) f32
    x = x_ref[...].astype(jnp.bfloat16)          # VPU cast; HBM read stays f32 once
    # Layer 1: bf16 MXU matmul, f32 accumulate; bias + ReLU epilogue in f32.
    h = jnp.dot(x, w1_ref[...], preferred_element_type=jnp.float32)
    h = jnp.maximum(h + b1_ref[...], 0.0)
    # Layer 2: single bf16 cast of the activation, f32 accumulate.
    y = jnp.dot(h.astype(jnp.bfloat16), w2_ref[...],
                preferred_element_type=jnp.float32)
    o_ref[...] = (y + b2_ref[...]).astype(o_ref.dtype)


def _round_up(x, m):
    return ((x + m - 1) // m) * m


def _pick_tile(b_pad, cap):
    """Largest multiple of 8 <= cap that divides b_pad (b_pad % 8 == 0)."""
    tb = max(8, min(cap, b_pad))
    tb -= tb % 8
    while b_pad % tb:
        tb -= 8
    return tb


def prepare_params(w1, b1, w2, b2):
    """One-time parameter prep, hoisted out of the per-forward hot path:
    weights cast to bf16 for the MXU, biases kept f32 and shaped (1, dim)."""
    return (w1.astype(jnp.bfloat16),
            jnp.asarray(b1, jnp.float32).reshape(1, -1),
            w2.astype(jnp.bfloat16),
            jnp.asarray(b2, jnp.float32).reshape(1, -1))


def base_model_forward(x, params, *, tb_max=512):
    """x: (B, in_dim) f32; params = prepare_params(...) with weights stored
    (in_features, out_features)."""
    w1, b1, w2, b2 = params
    B, in_dim = x.shape
    hid_dim = w1.shape[1]
    out_dim = w2.shape[1]

    # Batch padded only to the sublane quantum (8); tile must divide it.
    b_pad = _round_up(B, 8)
    tb = _pick_tile(b_pad, tb_max)
    if b_pad // tb < 2 and b_pad >= 16:
        # Give v7x's two TensorCores at least one batch tile each.
        tb = _pick_tile(b_pad, b_pad // 2)
    grid = (b_pad // tb,)

    x_in = x if b_pad == B else jnp.zeros((b_pad, in_dim), x.dtype).at[:B].set(x)

    # VMEM budget: single-buffered resident weights/biases + double-buffered
    # x/out tiles; 2x headroom, capped at v7x's 64 MiB physical VMEM.
    resident = w1.nbytes + b1.nbytes + w2.nbytes + b2.nbytes
    streamed = 2 * (tb * in_dim * x_in.dtype.itemsize + tb * out_dim * 4)
    vmem_limit = int(min(max(2 * (resident + streamed), 32 * 1024 * 1024),
                         64 * 1024 * 1024))

    cost = pl.CostEstimate(
        flops=2 * b_pad * (in_dim * hid_dim + hid_dim * out_dim),
        transcendentals=0,
        bytes_accessed=x_in.nbytes + resident + b_pad * out_dim * 4)

    def _run(resident_kwargs):
        return pl.pallas_call(
            mlp_kernel,
            out_shape=jax.ShapeDtypeStruct((b_pad, out_dim), jnp.float32),
            grid_spec=pltpu.PrefetchScalarGridSpec(
                num_scalar_prefetch=0,
                grid=grid,
                in_specs=[
                    # x tile streams over the batch (double-buffered pipeline).
                    pl.BlockSpec((tb, in_dim), lambda i: (i, 0)),
                    # Weights / biases: full-array blocks, constant index ->
                    # VMEM-resident across all batch tiles.
                    pl.BlockSpec((in_dim, hid_dim), lambda i: (0, 0),
                                 **resident_kwargs),
                    pl.BlockSpec((1, hid_dim), lambda i: (0, 0),
                                 **resident_kwargs),
                    pl.BlockSpec((hid_dim, out_dim), lambda i: (0, 0),
                                 **resident_kwargs),
                    pl.BlockSpec((1, out_dim), lambda i: (0, 0),
                                 **resident_kwargs),
                ],
                out_specs=pl.BlockSpec((tb, out_dim), lambda i: (i, 0)),
            ),
            compiler_params=pltpu.CompilerParams(
                dimension_semantics=("parallel",),
                vmem_limit_bytes=vmem_limit),
            cost_estimate=cost,
            # TODO(synk): for production-scale hidden/output dims, tile W1 over
            # N and W2 over K (256-wide tiles for the v6e/v7x MXU) with a
            # pl.when-guarded f32 accumulator instead of full weight residency
            # (v7x has only 64 MiB VMEM).
        )(x_in, w1, b1, w2, b2)

    try:
        # Constant-index weights/biases single-buffered (halves their VMEM use).
        out_padded = _run(dict(pipeline_mode=pl.Buffered(1)))
    except Exception:  # Fallback for Pallas versions without pipeline_mode.
        out_padded = _run({})

    # Strip batch padding outside the kernel (no-op slice when B % 8 == 0).
    return out_padded[:B].astype(x.dtype)


def init_linear_params(key, in_dim, out_dim, dtype=jnp.float32):
    # Deterministic init mirroring nn.Linear's U(-1/sqrt(fan_in), 1/sqrt(fan_in)).
    kw, kb = jax.random.split(key)
    bound = 1.0 / (in_dim ** 0.5)
    # Stored as (in_dim, out_dim) so forward is x @ W + b.
    w = jax.random.uniform(kw, (in_dim, out_dim), dtype, -bound, bound)
    b = jax.random.uniform(kb, (1, out_dim), dtype, -bound, bound)
    return w, b


if __name__ == "__main__":
    key = jax.random.PRNGKey(0)
    k_x, k_l1, k_l2 = jax.random.split(key, 3)

    # Small but non-trivial: batch large enough for 2 batch tiles.
    batch, input_dim, hidden_dim, output_dim = 512, 32, 64, 16

    x = jax.random.normal(k_x, (batch, input_dim), jnp.float32)
    w1, b1 = init_linear_params(k_l1, input_dim, hidden_dim)
    w2, b2 = init_linear_params(k_l2, hidden_dim, output_dim)

    params = prepare_params(w1, b1, w2, b2)   # one-time prep, off the hot path
    out = base_model_forward(x, params)
    out = jax.block_until_ready(out)

    # Pure-JAX f32 reference; bf16 MXU path needs a looser tolerance.
    ref = jnp.maximum(x @ w1 + b1, 0.0) @ w2 + b2
    assert out.shape == (batch, output_dim)
    assert jnp.allclose(out, ref, atol=2e-2, rtol=2e-2), \
        f"max abs err {jnp.max(jnp.abs(out - ref))}"

    print("KERNEL_OK")
</pallas_src>

<mosaic_0001>
module attributes {stable_mosaic.version = 11 : i64} {
  func.func @mlp_kernel(%arg0: i32, %arg1: memref<256x32xf32, #tpu.memory_space<vmem>>, %arg2: memref<32x64xbf16, #tpu.memory_space<vmem>>, %arg3: memref<1x64xf32, #tpu.memory_space<vmem>>, %arg4: memref<64x16xbf16, #tpu.memory_space<vmem>>, %arg5: memref<1x16xf32, #tpu.memory_space<vmem>>, %arg6: memref<256x16xf32, #tpu.memory_space<vmem>>) attributes {dimension_semantics = [#tpu.dimension_semantics<parallel>], iteration_bounds = array<i64: 2>, scalar_prefetch = 0 : i64, scratch_operands = 0 : i64, tpu.core_type = #tpu.core_type<tc>, window_params = [{transform_indices = @transform_0, window_bounds = array<i64: 256, 32>}, {pipeline_mode = #tpu.pipeline_mode<synchronous>, transform_indices = @transform_1, window_bounds = array<i64: 32, 64>}, {pipeline_mode = #tpu.pipeline_mode<synchronous>, transform_indices = @transform_2, window_bounds = array<i64: 1, 64>}, {pipeline_mode = #tpu.pipeline_mode<synchronous>, transform_indices = @transform_3, window_bounds = array<i64: 64, 16>}, {pipeline_mode = #tpu.pipeline_mode<synchronous>, transform_indices = @transform_4, window_bounds = array<i64: 1, 16>}, {transform_indices = @transform_5, window_bounds = array<i64: 256, 16>}]} {
    %c0 = arith.constant 0 : index
    %c0_0 = arith.constant 0 : index
    %0 = vector.load %arg1[%c0, %c0_0] : memref<256x32xf32, #tpu.memory_space<vmem>>, vector<256x32xf32>
    %1 = arith.truncf %0 : vector<256x32xf32> to vector<256x32xbf16>
    %c0_1 = arith.constant 0 : index
    %c0_2 = arith.constant 0 : index
    %2 = vector.load %arg2[%c0_1, %c0_2] : memref<32x64xbf16, #tpu.memory_space<vmem>>, vector<32x64xbf16>
    %cst = arith.constant dense<0.000000e+00> : vector<256x64xf32>
    %3 = tpu.matmul %1, %2, %cst {dimension_numbers = #tpu.dot_dimension_numbers<[1], [0], [0], [1], [0, 0, 1, 1], [], []>} : vector<256x32xbf16>, vector<32x64xbf16>, vector<256x64xf32> -> vector<256x64xf32>
    %c0_3 = arith.constant 0 : index
    %c0_4 = arith.constant 0 : index
    %4 = vector.load %arg3[%c0_3, %c0_4] : memref<1x64xf32, #tpu.memory_space<vmem>>, vector<1x64xf32>
    %5 = vector.broadcast %4 : vector<1x64xf32> to vector<256x64xf32>
    %6 = arith.addf %3, %5 : vector<256x64xf32>
    %cst_5 = arith.constant 0.000000e+00 : f32
    %7 = vector.broadcast %cst_5 : f32 to vector<256x64xf32>
    %8 = arith.maximumf %6, %7 : vector<256x64xf32>
    %9 = arith.truncf %8 : vector<256x64xf32> to vector<256x64xbf16>
    %c0_6 = arith.constant 0 : index
    %c0_7 = arith.constant 0 : index
    %10 = vector.load %arg4[%c0_6, %c0_7] : memref<64x16xbf16, #tpu.memory_space<vmem>>, vector<64x16xbf16>
    %cst_8 = arith.constant dense<0.000000e+00> : vector<256x16xf32>
    %11 = tpu.matmul %9, %10, %cst_8 {dimension_numbers = #tpu.dot_dimension_numbers<[1], [0], [0], [1], [0, 0, 1, 1], [], []>} : vector<256x64xbf16>, vector<64x16xbf16>, vector<256x16xf32> -> vector<256x16xf32>
    %c0_9 = arith.constant 0 : index
    %c0_10 = arith.constant 0 : index
    %12 = vector.load %arg5[%c0_9, %c0_10] : memref<1x16xf32, #tpu.memory_space<vmem>>, vector<1x16xf32>
    %13 = vector.broadcast %12 : vector<1x16xf32> to vector<256x16xf32>
    %14 = arith.addf %11, %13 : vector<256x16xf32>
    %c0_11 = arith.constant 0 : index
    %c0_12 = arith.constant 0 : index
    %15 = vector.load %arg6[%c0_11, %c0_12] : memref<256x16xf32, #tpu.memory_space<vmem>>, vector<256x16xf32>
    tpu.vector_store %arg6[%c0_11, %c0_12], %14 {strides = array<i32>} : memref<256x16xf32, #tpu.memory_space<vmem>>, vector<256x16xf32>,
    return
  }
  func.func @transform_0(%arg0: i32) -> (i32, i32) {
    %c0_i32 = arith.constant 0 : i32
    %c0_i32_0 = arith.constant 0 : i32
    return %arg0, %c0_i32 : i32, i32
  }
  func.func @transform_1(%arg0: i32) -> (i32, i32) {
    %c0_i32 = arith.constant 0 : i32
    %c0_i32_0 = arith.constant 0 : i32
    %c0_i32_1 = arith.constant 0 : i32
    return %c0_i32, %c0_i32_0 : i32, i32
  }
  func.func @transform_2(%arg0: i32) -> (i32, i32) {
    %c0_i32 = arith.constant 0 : i32
    %c0_i32_0 = arith.constant 0 : i32
    %c0_i32_1 = arith.constant 0 : i32
    return %c0_i32, %c0_i32_0 : i32, i32
  }
  func.func @transform_3(%arg0: i32) -> (i32, i32) {
    %c0_i32 = arith.constant 0 : i32
    %c0_i32_0 = arith.constant 0 : i32
    %c0_i32_1 = arith.constant 0 : i32
    return %c0_i32, %c0_i32_0 : i32, i32
  }
  func.func @transform_4(%arg0: i32) -> (i32, i32) {
    %c0_i32 = arith.constant 0 : i32
    %c0_i32_0 = arith.constant 0 : i32
    %c0_i32_1 = arith.constant 0 : i32
    return %c0_i32, %c0_i32_0 : i32, i32
  }
  func.func @transform_5(%arg0: i32) -> (i32, i32) {
    %c0_i32 = arith.constant 0 : i32
    %c0_i32_0 = arith.constant 0 : i32
    return %arg0, %c0_i32 : i32, i32
  }
}

module attributes {stable_mosaic.version = 11 : i64} {
  func.func @mlp_kernel(%arg0: i32, %arg1: memref<256x32xf32, #tpu.memory_space<vmem>>, %arg2: memref<32x64xbf16, #tpu.memory_space<vmem>>, %arg3: memref<1x64xf32, #tpu.memory_space<vmem>>, %arg4: memref<64x16xbf16, #tpu.memory_space<vmem>>, %arg5: memref<1x16xf32, #tpu.memory_space<vmem>>, %arg6: memref<256x16xf32, #tpu.memory_space<vmem>>) attributes {dimension_semantics = [#tpu.dimension_semantics<parallel>], iteration_bounds = array<i64: 2>, scalar_prefetch = 0 : i64, scratch_operands = 0 : i64, tpu.core_type = #tpu.core_type<tc>, window_params = [{transform_indices = @transform_0, window_bounds = array<i64: 256, 32>}, {pipeline_mode = #tpu.pipeline_mode<synchronous>, transform_indices = @transform_1, window_bounds = array<i64: 32, 64>}, {pipeline_mode = #tpu.pipeline_mode<synchronous>, transform_indices = @transform_2, window_bounds = array<i64: 1, 64>}, {pipeline_mode = #tpu.pipeline_mode<synchronous>, transform_indices = @transform_3, window_bounds = array<i64: 64, 16>}, {pipeline_mode = #tpu.pipeline_mode<synchronous>, transform_indices = @transform_4, window_bounds = array<i64: 1, 16>}, {transform_indices = @transform_5, window_bounds = array<i64: 256, 16>}]} {
    %c0 = arith.constant 0 : index
    %c0_0 = arith.constant 0 : index
    %0 = vector.load %arg1[%c0, %c0_0] : memref<256x32xf32, #tpu.memory_space<vmem>>, vector<256x32xf32>
    %1 = arith.truncf %0 : vector<256x32xf32> to vector<256x32xbf16>
    %c0_1 = arith.constant 0 : index
    %c0_2 = arith.constant 0 : index
    %2 = vector.load %arg2[%c0_1, %c0_2] : memref<32x64xbf16, #tpu.memory_space<vmem>>, vector<32x64xbf16>
    %cst = arith.constant dense<0.000000e+00> : vector<256x64xf32>
    %3 = tpu.matmul %1, %2, %cst {dimension_numbers = #tpu.dot_dimension_numbers<[1], [0], [0], [1], [0, 0, 1, 1], [], []>} : vector<256x32xbf16>, vector<32x64xbf16>, vector<256x64xf32> -> vector<256x64xf32>
    %c0_3 = arith.constant 0 : index
    %c0_4 = arith.constant 0 : index
    %4 = vector.load %arg3[%c0_3, %c0_4] : memref<1x64xf32, #tpu.memory_space<vmem>>, vector<1x64xf32>
    %5 = vector.broadcast %4 : vector<1x64xf32> to vector<256x64xf32>
    %6 = arith.addf %3, %5 : vector<256x64xf32>
    %cst_5 = arith.constant 0.000000e+00 : f32
    %7 = vector.broadcast %cst_5 : f32 to vector<256x64xf32>
    %8 = arith.maximumf %6, %7 : vector<256x64xf32>
    %9 = arith.truncf %8 : vector<256x64xf32> to vector<256x64xbf16>
    %c0_6 = arith.constant 0 : index
    %c0_7 = arith.constant 0 : index
    %10 = vector.load %arg4[%c0_6, %c0_7] : memref<64x16xbf16, #tpu.memory_space<vmem>>, vector<64x16xbf16>
    %cst_8 = arith.constant dense<0.000000e+00> : vector<256x16xf32>
    %11 = tpu.matmul %9, %10, %cst_8 {dimension_numbers = #tpu.dot_dimension_numbers<[1], [0], [0], [1], [0, 0, 1, 1], [], []>} : vector<256x64xbf16>, vector<64x16xbf16>, vector<256x16xf32> -> vector<256x16xf32>
    %c0_9 = arith.constant 0 : index
    %c0_10 = arith.constant 0 : index
    %12 = vector.load %arg5[%c0_9, %c0_10] : memref<1x16xf32, #tpu.memory_space<vmem>>, vector<1x16xf32>
    %13 = vector.broadcast %12 : vector<1x16xf32> to vector<256x16xf32>
    %14 = arith.addf %11, %13 : vector<256x16xf32>
    %c0_11 = arith.constant 0 : index
    %c0_12 = arith.constant 0 : index
    %15 = vector.load %arg6[%c0_11, %c0_12] : memref<256x16xf32, #tpu.memory_space<vmem>>, vector<256x16xf32>
    tpu.vector_store %arg6[%c0_11, %c0_12], %14 {strides = array<i32>} : memref<256x16xf32, #tpu.memory_space<vmem>>, vector<256x16xf32>,
    return
  }
  func.func @transform_0(%arg0: i32) -> (i32, i32) {
    %c0_i32 = arith.constant 0 : i32
    %c0_i32_0 = arith.constant 0 : i32
    return %arg0, %c0_i32 : i32, i32
  }
  func.func @transform_1(%arg0: i32) -> (i32, i32) {
    %c0_i32 = arith.constant 0 : i32
    %c0_i32_0 = arith.constant 0 : i32
    %c0_i32_1 = arith.constant 0 : i32
    return %c0_i32, %c0_i32_0 : i32, i32
  }
  func.func @transform_2(%arg0: i32) -> (i32, i32) {
    %c0_i32 = arith.constant 0 : i32
    %c0_i32_0 = arith.constant 0 : i32
    %c0_i32_1 = arith.constant 0 : i32
    return %c0_i32, %c0_i32_0 : i32, i32
  }
  func.func @transform_3(%arg0: i32) -> (i32, i32) {
    %c0_i32 = arith.constant 0 : i32
    %c0_i32_0 = arith.constant 0 : i32
    %c0_i32_1 = arith.constant 0 : i32
    return %c0_i32, %c0_i32_0 : i32, i32
  }
  func.func @transform_4(%arg0: i32) -> (i32, i32) {
    %c0_i32 = arith.constant 0 : i32
    %c0_i32_0 = arith.constant 0 : i32
    %c0_i32_1 = arith.constant 0 : i32
    return %c0_i32, %c0_i32_0 : i32, i32
  }
  func.func @transform_5(%arg0: i32) -> (i32, i32) {
    %c0_i32 = arith.constant 0 : i32
    %c0_i32_0 = arith.constant 0 : i32
    return %arg0, %c0_i32 : i32, i32
  }
}

</mosaic_0001>

<bundles_post_ra>
// kernel: tpu_custom_call.1
= control target key start
LH: loop header
LB: loop body
LE: loop exit
PB: predicated region body
PF: predicated region fallthrough
CT: control target
= control target key end

     0   :  { %s1113_s18 = smov 0   ;;  %s1361_s0 = inlined_call_operand.vmem [shape: f32[512,32], index: 0, kind: input, shape index: {}]   ;;  %s1362_s1 = inlined_call_operand.vmem [shape: bf16[32,64], index: 1, kind: input, shape index: {}]   ;;  %s1363_s2 = inlined_call_operand.vmem [shape: f32[1,64], index: 2, kind: input, shape index: {}]   ;;  %s1364_s3 = inlined_call_operand.vmem [shape: bf16[64,16], index: 3, kind: input, shape index: {}]   ;;  %s1365_s4 = inlined_call_operand.vmem [shape: f32[1,16], index: 4, kind: input, shape index: {}]   ;;  %s1366_s5 = inlined_call_operand.vmem [shape: f32[512,16], index: 5, kind: output, shape index: {}]  }
   0x1 LB: > { %s896_s19 = sadd.s32 4294967295, %s1081_s18   ;;  %p900_p0 = scmp.ge.s32.totalorder %s1081_s18, 1  ;;  %s1081_s18 = sphi %s1113_s18, %s15_s18  }
   0x2   : > { %p188_p1 = scmp.lt.s32.totalorder %s1081_s18, 3 }
   0x4   : > { %p189_p2 = pnand %p900_p0, %p188_p1 }
   0x5   : > { %v1069_v0 = vld [vmem:[%s1362_s1] sm:$0xff] (!%p189_p2)   ;;  %s901_s22 = sshll.u32 (!%p189_p2), %s896_s19, 5  ;;  %v1070_v1 = vld [vmem:[%s1362_s1 + $0x8] sm:$0xff] (!%p189_p2)   ;;  %vm300_vm0 = vcmask (!%p189_p2), 261120   ;;  %v1073_v52 = vld [vmem:[%s1364_s3 + $0x10] sm:$0xff] (!%p189_p2)   ;;  %vm597_vm1 = vcmask (!%p189_p2), 523264  }
   0x6   : > { %192 = sbr.rel (%p189_p2) target bundleno = 516 (0x204), region = 40  ;;  %p217_p3 = scmp.lt.s32.totalorder (!%p189_p2), %s901_s22, 63  ;;  %985 = vmatprep.subr.bf16.mxu0 (!%p189_p2), %v1069_v0  ;;  %v1071_v2 = vld [vmem:[%s1364_s3] sm:$0xff] (!%p189_p2)   ;;  %v1072_v3 = vld [vmem:[%s1364_s3 + $0x8] sm:$0xff] (!%p189_p2)   ;;  %v1074_v53 = vld [vmem:[%s1364_s3 + $0x18] sm:$0xff] (!%p189_p2)   ;;  %vm807_vm2 = vcmask (!%p189_p2), 130048  }
   0x7   : > { %986 = vmatpush3.bf16.msra.mxu0 (!%p189_p2), %v1069_v0  ;;  %1021 = vmatprep.subr.bf16.mxu1 (!%p189_p2), %v1071_v2  ;;  %v1200_v54 = vld [vmem:[%s1363_s2] ss:$0 sm:$0xff] (!%p189_p2) }
   0x8   : > { %987 = vmatprep.subr.bf16.mxu0 (!%p189_p2), %v1070_v1  ;;  %1022 = vmatpush3.bf16.msra.mxu1 (!%p189_p2), %v1071_v2 }
   0x9   : > { %1023 = vmatprep.subr.bf16.mxu1 (!%p189_p2), %v1072_v3 }
   0xb   : > { %988 = vmatpush3.bf16.msra.mxu0 (!%p189_p2), %v1070_v1 }
   0xc   : > { %1024 = vmatpush3.bf16.msra.mxu1 (!%p189_p2), %v1072_v3 }
   0xd   : > { %s1368_s22 = smov (!%p217_p3, %s901_s22), 63  ;;  %1025 = vmatprep.subr.bf16.mxu1 %v1073_v52 }
   0xe   : > { %s902_s29 = sshll.u32 %s1368_s22, 3 }
   0xf   : > { %s1141_s7 = scalar_lea.vmem %s1361_s0, %s902_s29  ;;  %s1260_s19 = scalar_lea.vmem %s1366_s5, %s902_s29 }
  0x10   : > { %v229_v4 = vld [vmem:[%s1141_s7] sm:$0xff]  ;;  %v230_v5 = vld [vmem:[%s1141_s7 + $0x8] sm:$0xff]  ;;  %v231_v6 = vld [vmem:[%s1141_s7 + $0x10] sm:$0xff]  ;;  %1026 = vmatpush3.bf16.msra.mxu1 %v1073_v52 }
  0x11   : > { %v261_v7 = vpack.c.bf16 %v230_v5, %v229_v4  ;;  %v232_v8 = vld [vmem:[%s1141_s7 + $0x18] sm:$0xff]  ;;  %v233_v9 = vld [vmem:[%s1141_s7 + $0x20] sm:$0xff]  ;;  %v234_v10 = vld [vmem:[%s1141_s7 + $0x28] sm:$0xff]  ;;  %1027 = vmatprep.subr.bf16.mxu1 %v1074_v53 }
  0x12   : > { %v262_v11 = vpack.c.bf16 %v232_v8, %v231_v6  ;;  %v263_v12 = vpack.c.bf16 %v234_v10, %v233_v9  ;;  %v235_v13 = vld [vmem:[%s1141_s7 + $0x30] sm:$0xff]  ;;  %v236_v14 = vld [vmem:[%s1141_s7 + $0x38] sm:$0xff]  ;;  %v237_v15 = vld [vmem:[%s1141_s7 + $0x40] sm:$0xff] }
  0x13   : > { %989 = vmatprep.mubr.msk.bf16.mxu0 %vm300_vm0, %v261_v7  ;;  %v238_v16 = vld [vmem:[%s1141_s7 + $0x48] sm:$0xff]  ;;  %v264_v17 = vpack.c.bf16 %v236_v14, %v235_v13  ;;  %v239_v19 = vld [vmem:[%s1141_s7 + $0x50] sm:$0xff]  ;;  %v240_v20 = vld [vmem:[%s1141_s7 + $0x58] sm:$0xff] }
  0x14   : > { %990 = vmatmul.mubr.msk.bf16.vlgmr.msra.gmra.mrb[0].mxu0 %vm300_vm0, %v262_v11  ;;  %v265_v18 = vpack.c.bf16 %v238_v16, %v237_v15  ;;  %v241_v21 = vld [vmem:[%s1141_s7 + $0x60] sm:$0xff]  ;;  %v242_v22 = vld [vmem:[%s1141_s7 + $0x68] sm:$0xff]  ;;  %v266_v23 = vpack.c.bf16 %v240_v20, %v239_v19  ;;  %v243_v25 = vld [vmem:[%s1141_s7 + $0x70] sm:$0xff]  ;;  %1028 = vmatpush3.bf16.msra.mxu1 %v1074_v53 }
  0x15   : > { %993 = vmatprep.mubr.msk.bf16.mxu0 %vm300_vm0, %v263_v12  ;;  %v267_v24 = vpack.c.bf16 %v242_v22, %v241_v21  ;;  %v244_v26 = vld [vmem:[%s1141_s7 + $0x78] sm:$0xff]  ;;  %v245_v27 = vld [vmem:[%s1141_s7 + $0x80] sm:$0xff]  ;;  %v246_v28 = vld [vmem:[%s1141_s7 + $0x88] sm:$0xff] }
  0x16   : > { %v268_v29 = vpack.c.bf16 %v244_v26, %v243_v25  ;;  %v269_v30 = vpack.c.bf16 %v246_v28, %v245_v27  ;;  %v247_v31 = vld [vmem:[%s1141_s7 + $0x90] sm:$0xff]  ;;  %v248_v32 = vld [vmem:[%s1141_s7 + $0x98] sm:$0xff]  ;;  %v249_v33 = vld [vmem:[%s1141_s7 + $0xa0] sm:$0xff] }
  0x17   : > { %v250_v34 = vld [vmem:[%s1141_s7 + $0xa8] sm:$0xff]  ;;  %v270_v35 = vpack.c.bf16 %v248_v32, %v247_v31  ;;  %v251_v37 = vld [vmem:[%s1141_s7 + $0xb0] sm:$0xff]  ;;  %v252_v38 = vld [vmem:[%s1141_s7 + $0xb8] sm:$0xff] }
  0x18   : > { %v271_v36 = vpack.c.bf16 %v250_v34, %v249_v33  ;;  %v253_v39 = vld [vmem:[%s1141_s7 + $0xc0] sm:$0xff]  ;;  %v254_v40 = vld [vmem:[%s1141_s7 + $0xc8] sm:$0xff]  ;;  %v272_v41 = vpack.c.bf16 %v252_v38, %v251_v37  ;;  %v255_v43 = vld [vmem:[%s1141_s7 + $0xd0] sm:$0xff] }
  0x19   : > { %v273_v42 = vpack.c.bf16 %v254_v40, %v253_v39  ;;  %v256_v44 = vld [vmem:[%s1141_s7 + $0xd8] sm:$0xff]  ;;  %v257_v45 = vld [vmem:[%s1141_s7 + $0xe0] sm:$0xff]  ;;  %v258_v46 = vld [vmem:[%s1141_s7 + $0xe8] sm:$0xff] }
  0x1a   : > { %v274_v47 = vpack.c.bf16 %v256_v44, %v255_v43  ;;  %v275_v48 = vpack.c.bf16 %v258_v46, %v257_v45  ;;  %v259_v49 = vld [vmem:[%s1141_s7 + $0xf0] sm:$0xff]  ;;  %v260_v50 = vld [vmem:[%s1141_s7 + $0xf8] sm:$0xff] }
  0x1b   : > { %v276_v51 = vpack.c.bf16 %v260_v50, %v259_v49 }
  0x1c   : > { %994 = vmatmul.mubr.msk.bf16.gmra.mrb[4].mxu0 %vm300_vm0, %v264_v17 }
  0x1d   : > { %997 = vmatprep.mubr.msk.bf16.mxu0 %vm300_vm0, %v265_v18 }
  0x24   : > { %998 = vmatmul.mubr.msk.bf16.gmra.mrb[8].mxu0 %vm300_vm0, %v266_v23 }
  0x25   : > { %1001 = vmatprep.mubr.msk.bf16.mxu0 %vm300_vm0, %v267_v24 }
  0x2c   : > { %1002 = vmatmul.mubr.msk.bf16.gmra.mrb[12].mxu0 %vm300_vm0, %v268_v29 }
  0x2d   : > { %1005 = vmatprep.mubr.msk.bf16.mxu0 %vm300_vm0, %v269_v30 }
  0x34   : > { %1006 = vmatmul.mubr.msk.bf16.gmra.mrb[16].mxu0 %vm300_vm0, %v270_v35 }
  0x35   : > { %1009 = vmatprep.mubr.msk.bf16.mxu0 %vm300_vm0, %v271_v36 }
  0x3c   : > { %1010 = vmatmul.mubr.msk.bf16.gmra.mrb[20].mxu0 %vm300_vm0, %v272_v41 }
  0x3d   : > { %1013 = vmatprep.mubr.msk.bf16.mxu0 %vm300_vm0, %v273_v42 }
  0x44   : > { %1014 = vmatmul.mubr.msk.bf16.gmra.mrb[24].mxu0 %vm300_vm0, %v274_v47 }
  0x45   : > { %1017 = vmatprep.mubr.msk.bf16.mxu0 %vm300_vm0, %v275_v48 }
  0x4c   : > { %1018 = vmatmul.mubr.msk.bf16.gmra.mrb[28].mxu0 %vm300_vm0, %v276_v51 }
  0xe7   : > { %v991_v55 = vpop.f32.mrb[0].mxu0 }
  0xe8   : > { %v392_v56 = vadd.f32 %v991_v55, %v1200_v54  ;;  %v383_v57 = vpop.f32.mrb[1].mxu0 }
  0xe9   : > { %v384_v58 = vadd.f32 %v1200_v54, %v383_v57  ;;  %v992_v59 = vpop.f32.mrb[2].mxu0 }
  0xea   : > { %v395_v60 = vadd.f32 %v992_v59, %v1200_v54  ;;  %v386_v61 = vpop.f32.mrb[3].mxu0  ;;  %v512_v63 = vmax.f32 %v392_v56, 0.0 }
  0xeb   : > { %v387_v62 = vadd.f32 %v1200_v54, %v386_v61  ;;  %v510_v1 = vmax.f32 %v384_v58, 0.0 }
  0xec   : > { %v513_v0 = vmax.f32 %v395_v60, 0.0 }
  0xed   : > { %v511_v2 = vmax.f32 %v387_v62, 0.0 }
  0xee   : > { %v543_v3 = vpack.c.bf16 %v513_v0, %v512_v63 }
  0xef   : > { %v995_v4 = vpop.f32.mrb[4].mxu0  ;;  %v542_v5 = vpack.c.bf16 %v511_v2, %v510_v1 }
  0xf0   : > { %v408_v6 = vadd.f32 %v995_v4, %v1200_v54  ;;  %v399_v7 = vpop.f32.mrb[5].mxu0 }
  0xf1   : > { %v400_v8 = vadd.f32 %v1200_v54, %v399_v7  ;;  %v996_v9 = vpop.f32.mrb[6].mxu0  ;;  %1029 = vmatprep.mubr.msk.bf16.mxu1 %vm597_vm1, %v542_v5 }
  0xf2   : > { %v411_v10 = vadd.f32 %v996_v9, %v1200_v54  ;;  %v402_v11 = vpop.f32.mrb[7].mxu0  ;;  %1030 = vmatmul.mubr.msk.bf16.vlgmr.msra.gmra.mrb[0].mxu1 %vm597_vm1, %v543_v3  ;;  %v516_v13 = vmax.f32 %v408_v6, 0.0 }
  0xf3   : > { %v403_v12 = vadd.f32 %v1200_v54, %v402_v11  ;;  %v514_v15 = vmax.f32 %v400_v8, 0.0 }
  0xf4   : > { %v517_v14 = vmax.f32 %v411_v10, 0.0 }
  0xf5   : > { %v515_v16 = vmax.f32 %v403_v12, 0.0 }
  0xf6   : > { %v545_v17 = vpack.c.bf16 %v517_v14, %v516_v13 }
  0xf7   : > { %v544_v18 = vpack.c.bf16 %v515_v16, %v514_v15  ;;  %v999_v19 = vpop.f32.mrb[8].mxu0 }
  0xf8   : > { %v424_v20 = vadd.f32 %v999_v19, %v1200_v54  ;;  %v415_v21 = vpop.f32.mrb[9].mxu0 }
  0xf9   : > { %v416_v22 = vadd.f32 %v1200_v54, %v415_v21  ;;  %v1000_v23 = vpop.f32.mrb[10].mxu0  ;;  %1033 = vmatprep.mubr.msk.bf16.mxu1 %vm597_vm1, %v544_v18 }
  0xfa   : > { %v427_v24 = vadd.f32 %v1000_v23, %v1200_v54  ;;  %v418_v25 = vpop.f32.mrb[11].mxu0  ;;  %1034 = vmatmul.mubr.msk.bf16.gmra.mrb[4].mxu1 %vm597_vm1, %v545_v17  ;;  %v520_v27 = vmax.f32 %v424_v20, 0.0 }
  0xfb   : > { %v419_v26 = vadd.f32 %v1200_v54, %v418_v25  ;;  %v518_v29 = vmax.f32 %v416_v22, 0.0 }
  0xfc   : > { %v521_v28 = vmax.f32 %v427_v24, 0.0 }
  0xfd   : > { %v519_v30 = vmax.f32 %v419_v26, 0.0 }
  0xfe   : > { %v547_v31 = vpack.c.bf16 %v521_v28, %v520_v27 }
  0xff   : > { %v546_v32 = vpack.c.bf16 %v519_v30, %v518_v29  ;;  %v1003_v33 = vpop.f32.mrb[12].mxu0 }
 0x100   : > { %v440_v34 = vadd.f32 %v1003_v33, %v1200_v54  ;;  %v431_v35 = vpop.f32.mrb[13].mxu0 }
 0x101   : > { %v432_v36 = vadd.f32 %v1200_v54, %v431_v35  ;;  %v1004_v37 = vpop.f32.mrb[14].mxu0  ;;  %1037 = vmatprep.mubr.msk.bf16.mxu1 %vm597_vm1, %v546_v32 }
 0x102   : > { %v443_v38 = vadd.f32 %v1004_v37, %v1200_v54  ;;  %v434_v39 = vpop.f32.mrb[15].mxu0  ;;  %1038 = vmatmul.mubr.msk.bf16.gmra.mrb[8].mxu1 %vm597_vm1, %v547_v31  ;;  %v524_v41 = vmax.f32 %v440_v34, 0.0 }
 0x103   : > { %v435_v40 = vadd.f32 %v1200_v54, %v434_v39  ;;  %v522_v43 = vmax.f32 %v432_v36, 0.0 }
 0x104   : > { %v525_v42 = vmax.f32 %v443_v38, 0.0 }
 0x105   : > { %v523_v44 = vmax.f32 %v435_v40, 0.0  ;;  %v1253_v40 = vld [vmem:[%s1365_s4] ss:$0 sm:$0xff] }
 0x106   : > { %v549_v45 = vpack.c.bf16 %v525_v42, %v524_v41 }
 0x107   : > { %v548_v46 = vpack.c.bf16 %v523_v44, %v522_v43  ;;  %v1007_v47 = vpop.f32.mrb[16].mxu0 }
 0x108   : > { %v456_v48 = vadd.f32 %v1007_v47, %v1200_v54  ;;  %v447_v49 = vpop.f32.mrb[17].mxu0 }
 0x109   : > { %v448_v50 = vadd.f32 %v1200_v54, %v447_v49  ;;  %v1008_v51 = vpop.f32.mrb[18].mxu0  ;;  %1041 = vmatprep.mubr.msk.bf16.mxu1 %vm597_vm1, %v548_v46 }
 0x10a   : > { %v459_v52 = vadd.f32 %v1008_v51, %v1200_v54  ;;  %v450_v53 = vpop.f32.mrb[19].mxu0  ;;  %1042 = vmatmul.mubr.msk.bf16.gmra.mrb[12].mxu1 %vm597_vm1, %v549_v45  ;;  %v528_v56 = vmax.f32 %v456_v48, 0.0 }
 0x10b   : > { %v451_v55 = vadd.f32 %v1200_v54, %v450_v53  ;;  %v526_v58 = vmax.f32 %v448_v50, 0.0 }
 0x10c   : > { %v529_v57 = vmax.f32 %v459_v52, 0.0 }
 0x10d   : > { %v527_v59 = vmax.f32 %v451_v55, 0.0 }
 0x10e   : > { %v551_v60 = vpack.c.bf16 %v529_v57, %v528_v56 }
 0x10f   : > { %v550_v61 = vpack.c.bf16 %v527_v59, %v526_v58  ;;  %v1011_v62 = vpop.f32.mrb[20].mxu0 }
 0x110   : > { %v472_v63 = vadd.f32 %v1011_v62, %v1200_v54  ;;  %v463_v0 = vpop.f32.mrb[21].mxu0 }
 0x111   : > { %v464_v1 = vadd.f32 %v1200_v54, %v463_v0  ;;  %v1012_v2 = vpop.f32.mrb[22].mxu0  ;;  %1045 = vmatprep.mubr.msk.bf16.mxu1 %vm597_vm1, %v550_v61 }
 0x112   : > { %v475_v3 = vadd.f32 %v1012_v2, %v1200_v54  ;;  %v466_v4 = vpop.f32.mrb[23].mxu0  ;;  %1046 = vmatmul.mubr.msk.bf16.gmra.mrb[16].mxu1 %vm597_vm1, %v551_v60  ;;  %v532_v6 = vmax.f32 %v472_v63, 0.0 }
 0x113   : > { %v467_v5 = vadd.f32 %v1200_v54, %v466_v4  ;;  %v530_v8 = vmax.f32 %v464_v1, 0.0 }
 0x114   : > { %v533_v7 = vmax.f32 %v475_v3, 0.0 }
 0x115   : > { %v531_v9 = vmax.f32 %v467_v5, 0.0 }
 0x116   : > { %v553_v10 = vpack.c.bf16 %v533_v7, %v532_v6 }
 0x117   : > { %v552_v11 = vpack.c.bf16 %v531_v9, %v530_v8  ;;  %v1015_v12 = vpop.f32.mrb[24].mxu0 }
 0x118   : > { %v488_v13 = vadd.f32 %v1015_v12, %v1200_v54  ;;  %v479_v14 = vpop.f32.mrb[25].mxu0 }
 0x119   : > { %v480_v15 = vadd.f32 %v1200_v54, %v479_v14  ;;  %v1016_v16 = vpop.f32.mrb[26].mxu0  ;;  %1049 = vmatprep.mubr.msk.bf16.mxu1 %vm597_vm1, %v552_v11 }
 0x11a   : > { %v491_v17 = vadd.f32 %v1016_v16, %v1200_v54  ;;  %v482_v18 = vpop.f32.mrb[27].mxu0  ;;  %1050 = vmatmul.mubr.msk.bf16.gmra.mrb[20].mxu1 %vm597_vm1, %v553_v10  ;;  %v536_v20 = vmax.f32 %v488_v13, 0.0 }
 0x11b   : > { %v483_v19 = vadd.f32 %v1200_v54, %v482_v18  ;;  %v534_v22 = vmax.f32 %v480_v15, 0.0 }
 0x11c   : > { %v537_v21 = vmax.f32 %v491_v17, 0.0 }
 0x11d   : > { %v535_v23 = vmax.f32 %v483_v19, 0.0 }
 0x11e   : > { %v555_v24 = vpack.c.bf16 %v537_v21, %v536_v20 }
 0x11f   : > { %v554_v25 = vpack.c.bf16 %v535_v23, %v534_v22  ;;  %v1019_v26 = vpop.f32.mrb[28].mxu0 }
 0x120   : > { %v504_v27 = vadd.f32 %v1019_v26, %v1200_v54  ;;  %v495_v28 = vpop.f32.mrb[29].mxu0 }
 0x121   : > { %v496_v29 = vadd.f32 %v1200_v54, %v495_v28  ;;  %v1020_v30 = vpop.f32.mrb[30].mxu0  ;;  %1053 = vmatprep.mubr.msk.bf16.mxu1 %vm597_vm1, %v554_v25 }
 0x122   : > { %v507_v31 = vadd.f32 %v1020_v30, %v1200_v54  ;;  %v498_v32 = vpop.f32.mrb[31].mxu0  ;;  %1054 = vmatmul.mubr.msk.bf16.gmra.mrb[24].mxu1 %vm597_vm1, %v555_v24  ;;  %v540_v34 = vmax.f32 %v504_v27, 0.0 }
 0x123   : > { %v499_v33 = vadd.f32 %v1200_v54, %v498_v32  ;;  %v538_v36 = vmax.f32 %v496_v29, 0.0 }
 0x124   : > { %v541_v35 = vmax.f32 %v507_v31, 0.0 }
 0x125   : > { %v539_v37 = vmax.f32 %v499_v33, 0.0 }
 0x126   : > { %v557_v38 = vpack.c.bf16 %v541_v35, %v540_v34 }
 0x127   : > { %v556_v39 = vpack.c.bf16 %v539_v37, %v538_v36 }
 0x129   : > { %1057 = vmatprep.mubr.msk.bf16.mxu1 %vm597_vm1, %v556_v39 }
 0x12a   : > { %1058 = vmatmul.mubr.msk.bf16.gmra.mrb[28].mxu1 %vm597_vm1, %v557_v38 }
 0x1c5   : > { %v1031_v54 = vpop.f32.mrb[0].mxu1 }
 0x1c6   : > { %v689_v41 = vadd.f32 %v1031_v54, %v1253_v40  ;;  %v680_v42 = vpop.f32.mrb[1].mxu1 }
 0x1c7   : > { %v681_v43 = vadd.f32 %v1253_v40, %v680_v42  ;;  %v1032_v44 = vpop.f32.mrb[2].mxu1 }
 0x1c8   : > { %810 = vst.msk [vmem:[%s1260_s19 + $0x10] sm:$0xff] %vm807_vm2, %v689_v41  ;;  %v692_v45 = vadd.f32 %v1032_v44, %v1253_v40  ;;  %v683_v46 = vpop.f32.mrb[3].mxu1 }
 0x1c9   : > { %808 = vst.msk [vmem:[%s1260_s19] sm:$0xff] %vm807_vm2, %v681_v43  ;;  %v684_v47 = vadd.f32 %v1253_v40, %v683_v46 }
 0x1ca   : > { %811 = vst.msk [vmem:[%s1260_s19 + $0x18] sm:$0xff] %vm807_vm2, %v692_v45 }
 0x1cb   : > { %809 = vst.msk [vmem:[%s1260_s19 + $0x8] sm:$0xff] %vm807_vm2, %v684_v47 }
 0x1cd   : > { %v1035_v48 = vpop.f32.mrb[4].mxu1 }
 0x1ce   : > { %v705_v49 = vadd.f32 %v1035_v48, %v1253_v40  ;;  %v696_v50 = vpop.f32.mrb[5].mxu1 }
 0x1cf   : > { %v697_v51 = vadd.f32 %v1253_v40, %v696_v50  ;;  %v1036_v52 = vpop.f32.mrb[6].mxu1 }
 0x1d0   : > { %814 = vst.msk [vmem:[%s1260_s19 + $0x30] sm:$0xff] %vm807_vm2, %v705_v49  ;;  %v708_v53 = vadd.f32 %v1036_v52, %v1253_v40  ;;  %v699_v55 = vpop.f32.mrb[7].mxu1 }
 0x1d1   : > { %812 = vst.msk [vmem:[%s1260_s19 + $0x20] sm:$0xff] %vm807_vm2, %v697_v51  ;;  %v700_v56 = vadd.f32 %v1253_v40, %v699_v55 }
 0x1d2   : > { %815 = vst.msk [vmem:[%s1260_s19 + $0x38] sm:$0xff] %vm807_vm2, %v708_v53 }
 0x1d3   : > { %813 = vst.msk [vmem:[%s1260_s19 + $0x28] sm:$0xff] %vm807_vm2, %v700_v56 }
 0x1d5   : > { %v1039_v57 = vpop.f32.mrb[8].mxu1 }
 0x1d6   : > { %v721_v58 = vadd.f32 %v1039_v57, %v1253_v40  ;;  %v712_v59 = vpop.f32.mrb[9].mxu1 }
 0x1d7   : > { %v713_v60 = vadd.f32 %v1253_v40, %v712_v59  ;;  %v1040_v61 = vpop.f32.mrb[10].mxu1 }
 0x1d8   : > { %818 = vst.msk [vmem:[%s1260_s19 + $0x50] sm:$0xff] %vm807_vm2, %v721_v58  ;;  %v724_v62 = vadd.f32 %v1040_v61, %v1253_v40  ;;  %v715_v63 = vpop.f32.mrb[11].mxu1 }
 0x1d9   : > { %816 = vst.msk [vmem:[%s1260_s19 + $0x40] sm:$0xff] %vm807_vm2, %v713_v60  ;;  %v716_v0 = vadd.f32 %v1253_v40, %v715_v63 }
 0x1da   : > { %819 = vst.msk [vmem:[%s1260_s19 + $0x58] sm:$0xff] %vm807_vm2, %v724_v62 }
 0x1db   : > { %817 = vst.msk [vmem:[%s1260_s19 + $0x48] sm:$0xff] %vm807_vm2, %v716_v0 }
 0x1dd   : > { %v1043_v1 = vpop.f32.mrb[12].mxu1 }
 0x1de   : > { %v737_v2 = vadd.f32 %v1043_v1, %v1253_v40  ;;  %v728_v3 = vpop.f32.mrb[13].mxu1 }
 0x1df   : > { %v729_v4 = vadd.f32 %v1253_v40, %v728_v3  ;;  %v1044_v5 = vpop.f32.mrb[14].mxu1 }
 0x1e0   : > { %822 = vst.msk [vmem:[%s1260_s19 + $0x70] sm:$0xff] %vm807_vm2, %v737_v2  ;;  %v740_v6 = vadd.f32 %v1044_v5, %v1253_v40  ;;  %v731_v7 = vpop.f32.mrb[15].mxu1 }
 0x1e1   : > { %820 = vst.msk [vmem:[%s1260_s19 + $0x60] sm:$0xff] %vm807_vm2, %v729_v4  ;;  %v732_v8 = vadd.f32 %v1253_v40, %v731_v7 }
 0x1e2   : > { %823 = vst.msk [vmem:[%s1260_s19 + $0x78] sm:$0xff] %vm807_vm2, %v740_v6 }
 0x1e3   : > { %821 = vst.msk [vmem:[%s1260_s19 + $0x68] sm:$0xff] %vm807_vm2, %v732_v8 }
 0x1e5   : > { %v1047_v9 = vpop.f32.mrb[16].mxu1 }
 0x1e6   : > { %v753_v10 = vadd.f32 %v1047_v9, %v1253_v40  ;;  %v744_v11 = vpop.f32.mrb[17].mxu1 }
 0x1e7   : > { %v745_v12 = vadd.f32 %v1253_v40, %v744_v11  ;;  %v1048_v13 = vpop.f32.mrb[18].mxu1 }
 0x1e8   : > { %826 = vst.msk [vmem:[%s1260_s19 + $0x90] sm:$0xff] %vm807_vm2, %v753_v10  ;;  %v756_v14 = vadd.f32 %v1048_v13, %v1253_v40  ;;  %v747_v15 = vpop.f32.mrb[19].mxu1 }
 0x1e9   : > { %824 = vst.msk [vmem:[%s1260_s19 + $0x80] sm:$0xff] %vm807_vm2, %v745_v12  ;;  %v748_v16 = vadd.f32 %v1253_v40, %v747_v15 }
 0x1ea   : > { %827 = vst.msk [vmem:[%s1260_s19 + $0x98] sm:$0xff] %vm807_vm2, %v756_v14 }
 0x1eb   : > { %825 = vst.msk [vmem:[%s1260_s19 + $0x88] sm:$0xff] %vm807_vm2, %v748_v16 }
 0x1ed   : > { %v1051_v17 = vpop.f32.mrb[20].mxu1 }
 0x1ee   : > { %v769_v18 = vadd.f32 %v1051_v17, %v1253_v40  ;;  %v760_v19 = vpop.f32.mrb[21].mxu1 }
 0x1ef   : > { %v761_v20 = vadd.f32 %v1253_v40, %v760_v19  ;;  %v1052_v21 = vpop.f32.mrb[22].mxu1 }
 0x1f0   : > { %830 = vst.msk [vmem:[%s1260_s19 + $0xb0] sm:$0xff] %vm807_vm2, %v769_v18  ;;  %v772_v22 = vadd.f32 %v1052_v21, %v1253_v40  ;;  %v763_v23 = vpop.f32.mrb[23].mxu1 }
 0x1f1   : > { %828 = vst.msk [vmem:[%s1260_s19 + $0xa0] sm:$0xff] %vm807_vm2, %v761_v20  ;;  %v764_v24 = vadd.f32 %v1253_v40, %v763_v23 }
 0x1f2   : > { %831 = vst.msk [vmem:[%s1260_s19 + $0xb8] sm:$0xff] %vm807_vm2, %v772_v22 }
 0x1f3   : > { %829 = vst.msk [vmem:[%s1260_s19 + $0xa8] sm:$0xff] %vm807_vm2, %v764_v24 }
 0x1f5   : > { %v1055_v25 = vpop.f32.mrb[24].mxu1 }
 0x1f6   : > { %v785_v26 = vadd.f32 %v1055_v25, %v1253_v40  ;;  %v776_v27 = vpop.f32.mrb[25].mxu1 }
 0x1f7   : > { %v777_v28 = vadd.f32 %v1253_v40, %v776_v27  ;;  %v1056_v29 = vpop.f32.mrb[26].mxu1 }
 0x1f8   : > { %834 = vst.msk [vmem:[%s1260_s19 + $0xd0] sm:$0xff] %vm807_vm2, %v785_v26  ;;  %v788_v30 = vadd.f32 %v1056_v29, %v1253_v40  ;;  %v779_v31 = vpop.f32.mrb[27].mxu1 }
 0x1f9   : > { %832 = vst.msk [vmem:[%s1260_s19 + $0xc0] sm:$0xff] %vm807_vm2, %v777_v28  ;;  %v780_v32 = vadd.f32 %v1253_v40, %v779_v31 }
 0x1fa   : > { %835 = vst.msk [vmem:[%s1260_s19 + $0xd8] sm:$0xff] %vm807_vm2, %v788_v30 }
 0x1fb   : > { %833 = vst.msk [vmem:[%s1260_s19 + $0xc8] sm:$0xff] %vm807_vm2, %v780_v32 }
 0x1fd   : > { %v1059_v33 = vpop.f32.mrb[28].mxu1 }
 0x1fe   : > { %v801_v34 = vadd.f32 %v1059_v33, %v1253_v40  ;;  %v792_v35 = vpop.f32.mrb[29].mxu1 }
 0x1ff   : > { %v793_v36 = vadd.f32 %v1253_v40, %v792_v35  ;;  %v1060_v37 = vpop.f32.mrb[30].mxu1 }
 0x200   : > { %838 = vst.msk [vmem:[%s1260_s19 + $0xf0] sm:$0xff] %vm807_vm2, %v801_v34  ;;  %v804_v38 = vadd.f32 %v1060_v37, %v1253_v40  ;;  %v795_v39 = vpop.f32.mrb[31].mxu1 }
 0x201   : > { %836 = vst.msk [vmem:[%s1260_s19 + $0xe0] sm:$0xff] %vm807_vm2, %v793_v36  ;;  %v796_v54 = vadd.f32 %v1253_v40, %v795_v39 }
 0x202   : > { %839 = vst.msk [vmem:[%s1260_s19 + $0xf8] sm:$0xff] %vm807_vm2, %v804_v38 }
 0x203   : > { %837 = vst.msk [vmem:[%s1260_s19 + $0xe8] sm:$0xff] %vm807_vm2, %v796_v54 }
 0x204 PF: > { %s15_s18 = sadd.s32 1, %s1081_s18  }
 0x205   : > { %p12_p4 = scmp.ge.s32.totalorder %s15_s18, 4  }
 0x207   :  { %14 = sbr.rel (!%p12_p4) target bundleno = 1 (0x1), region = 70 }

// kernel: tpu_custom_call.1
= control target key start
LH: loop header
LB: loop body
LE: loop exit
PB: predicated region body
PF: predicated region fallthrough
CT: control target
= control target key end

     0   :  { %s1113_s18 = smov 0   ;;  %s1361_s0 = inlined_call_operand.vmem [shape: f32[512,32], index: 0, kind: input, shape index: {}]   ;;  %s1362_s1 = inlined_call_operand.vmem [shape: bf16[32,64], index: 1, kind: input, shape index: {}]   ;;  %s1363_s2 = inlined_call_operand.vmem [shape: f32[1,64], index: 2, kind: input, shape index: {}]   ;;  %s1364_s3 = inlined_call_operand.vmem [shape: bf16[64,16], index: 3, kind: input, shape index: {}]   ;;  %s1365_s4 = inlined_call_operand.vmem [shape: f32[1,16], index: 4, kind: input, shape index: {}]   ;;  %s1366_s5 = inlined_call_operand.vmem [shape: f32[512,16], index: 5, kind: output, shape index: {}]  }
   0x1 LB: > { %s896_s19 = sadd.s32 4294967295, %s1081_s18   ;;  %p900_p0 = scmp.ge.s32.totalorder %s1081_s18, 1  ;;  %s1081_s18 = sphi %s1113_s18, %s15_s18  }
   0x2   : > { %p188_p1 = scmp.lt.s32.totalorder %s1081_s18, 3 }
   0x4   : > { %p189_p2 = pnand %p900_p0, %p188_p1 }
   0x5   : > { %v1069_v0 = vld [vmem:[%s1362_s1] sm:$0xff] (!%p189_p2)   ;;  %s901_s22 = sshll.u32 (!%p189_p2), %s896_s19, 5  ;;  %v1070_v1 = vld [vmem:[%s1362_s1 + $0x8] sm:$0xff] (!%p189_p2)   ;;  %vm300_vm0 = vcmask (!%p189_p2), 261120   ;;  %v1073_v52 = vld [vmem:[%s1364_s3 + $0x10] sm:$0xff] (!%p189_p2)   ;;  %vm597_vm1 = vcmask (!%p189_p2), 523264  }
   0x6   : > { %192 = sbr.rel (%p189_p2) target bundleno = 516 (0x204), region = 40  ;;  %p217_p3 = scmp.lt.s32.totalorder (!%p189_p2), %s901_s22, 63  ;;  %985 = vmatprep.subr.bf16.mxu0 (!%p189_p2), %v1069_v0  ;;  %v1071_v2 = vld [vmem:[%s1364_s3] sm:$0xff] (!%p189_p2)   ;;  %v1072_v3 = vld [vmem:[%s1364_s3 + $0x8] sm:$0xff] (!%p189_p2)   ;;  %v1074_v53 = vld [vmem:[%s1364_s3 + $0x18] sm:$0xff] (!%p189_p2)   ;;  %vm807_vm2 = vcmask (!%p189_p2), 130048  }
   0x7   : > { %986 = vmatpush3.bf16.msra.mxu0 (!%p189_p2), %v1069_v0  ;;  %1021 = vmatprep.subr.bf16.mxu1 (!%p189_p2), %v1071_v2  ;;  %v1200_v54 = vld [vmem:[%s1363_s2] ss:$0 sm:$0xff] (!%p189_p2) }
   0x8   : > { %987 = vmatprep.subr.bf16.mxu0 (!%p189_p2), %v1070_v1  ;;  %1022 = vmatpush3.bf16.msra.mxu1 (!%p189_p2), %v1071_v2 }
   0x9   : > { %1023 = vmatprep.subr.bf16.mxu1 (!%p189_p2), %v1072_v3 }
   0xb   : > { %988 = vmatpush3.bf16.msra.mxu0 (!%p189_p2), %v1070_v1 }
   0xc   : > { %1024 = vmatpush3.bf16.msra.mxu1 (!%p189_p2), %v1072_v3 }
   0xd   : > { %s1368_s22 = smov (!%p217_p3, %s901_s22), 63  ;;  %1025 = vmatprep.subr.bf16.mxu1 %v1073_v52 }
   0xe   : > { %s902_s29 = sshll.u32 %s1368_s22, 3 }
   0xf   : > { %s1141_s7 = scalar_lea.vmem %s1361_s0, %s902_s29  ;;  %s1260_s19 = scalar_lea.vmem %s1366_s5, %s902_s29 }
  0x10   : > { %v229_v4 = vld [vmem:[%s1141_s7] sm:$0xff]  ;;  %v230_v5 = vld [vmem:[%s1141_s7 + $0x8] sm:$0xff]  ;;  %v231_v6 = vld [vmem:[%s1141_s7 + $0x10] sm:$0xff]  ;;  %1026 = vmatpush3.bf16.msra.mxu1 %v1073_v52 }
  0x11   : > { %v261_v7 = vpack.c.bf16 %v230_v5, %v229_v4  ;;  %v232_v8 = vld [vmem:[%s1141_s7 + $0x18] sm:$0xff]  ;;  %v233_v9 = vld [vmem:[%s1141_s7 + $0x20] sm:$0xff]  ;;  %v234_v10 = vld [vmem:[%s1141_s7 + $0x28] sm:$0xff]  ;;  %1027 = vmatprep.subr.bf16.mxu1 %v1074_v53 }
  0x12   : > { %v262_v11 = vpack.c.bf16 %v232_v8, %v231_v6  ;;  %v263_v12 = vpack.c.bf16 %v234_v10, %v233_v9  ;;  %v235_v13 = vld [vmem:[%s1141_s7 + $0x30] sm:$0xff]  ;;  %v236_v14 = vld [vmem:[%s1141_s7 + $0x38] sm:$0xff]  ;;  %v237_v15 = vld [vmem:[%s1141_s7 + $0x40] sm:$0xff] }
  0x13   : > { %989 = vmatprep.mubr.msk.bf16.mxu0 %vm300_vm0, %v261_v7  ;;  %v238_v16 = vld [vmem:[%s1141_s7 + $0x48] sm:$0xff]  ;;  %v264_v17 = vpack.c.bf16 %v236_v14, %v235_v13  ;;  %v239_v19 = vld [vmem:[%s1141_s7 + $0x50] sm:$0xff]  ;;  %v240_v20 = vld [vmem:[%s1141_s7 + $0x58] sm:$0xff] }
  0x14   : > { %990 = vmatmul.mubr.msk.bf16.vlgmr.msra.gmra.mrb[0].mxu0 %vm300_vm0, %v262_v11  ;;  %v265_v18 = vpack.c.bf16 %v238_v16, %v237_v15  ;;  %v241_v21 = vld [vmem:[%s1141_s7 + $0x60] sm:$0xff]  ;;  %v242_v22 = vld [vmem:[%s1141_s7 + $0x68] sm:$0xff]  ;;  %v266_v23 = vpack.c.bf16 %v240_v20, %v239_v19  ;;  %v243_v25 = vld [vmem:[%s1141_s7 + $0x70] sm:$0xff]  ;;  %1028 = vmatpush3.bf16.msra.mxu1 %v1074_v53 }
  0x15   : > { %993 = vmatprep.mubr.msk.bf16.mxu0 %vm300_vm0, %v263_v12  ;;  %v267_v24 = vpack.c.bf16 %v242_v22, %v241_v21  ;;  %v244_v26 = vld [vmem:[%s1141_s7 + $0x78] sm:$0xff]  ;;  %v245_v27 = vld [vmem:[%s1141_s7 + $0x80] sm:$0xff]  ;;  %v246_v28 = vld [vmem:[%s1141_s7 + $0x88] sm:$0xff] }
  0x16   : > { %v268_v29 = vpack.c.bf16 %v244_v26, %v243_v25  ;;  %v269_v30 = vpack.c.bf16 %v246_v28, %v245_v27  ;;  %v247_v31 = vld [vmem:[%s1141_s7 + $0x90] sm:$0xff]  ;;  %v248_v32 = vld [vmem:[%s1141_s7 + $0x98] sm:$0xff]  ;;  %v249_v33 = vld [vmem:[%s1141_s7 + $0xa0] sm:$0xff] }
  0x17   : > { %v250_v34 = vld [vmem:[%s1141_s7 + $0xa8] sm:$0xff]  ;;  %v270_v35 = vpack.c.bf16 %v248_v32, %v247_v31  ;;  %v251_v37 = vld [vmem:[%s1141_s7 + $0xb0] sm:$0xff]  ;;  %v252_v38 = vld [vmem:[%s1141_s7 + $0xb8] sm:$0xff] }
  0x18   : > { %v271_v36 = vpack.c.bf16 %v250_v34, %v249_v33  ;;  %v253_v39 = vld [vmem:[%s1141_s7 + $0xc0] sm:$0xff]  ;;  %v254_v40 = vld [vmem:[%s1141_s7 + $0xc8] sm:$0xff]  ;;  %v272_v41 = vpack.c.bf16 %v252_v38, %v251_v37  ;;  %v255_v43 = vld [vmem:[%s1141_s7 + $0xd0] sm:$0xff] }
  0x19   : > { %v273_v42 = vpack.c.bf16 %v254_v40, %v253_v39  ;;  %v256_v44 = vld [vmem:[%s1141_s7 + $0xd8] sm:$0xff]  ;;  %v257_v45 = vld [vmem:[%s1141_s7 + $0xe0] sm:$0xff]  ;;  %v258_v46 = vld [vmem:[%s1141_s7 + $0xe8] sm:$0xff] }
  0x1a   : > { %v274_v47 = vpack.c.bf16 %v256_v44, %v255_v43  ;;  %v275_v48 = vpack.c.bf16 %v258_v46, %v257_v45  ;;  %v259_v49 = vld [vmem:[%s1141_s7 + $0xf0] sm:$0xff]  ;;  %v260_v50 = vld [vmem:[%s1141_s7 + $0xf8] sm:$0xff] }
  0x1b   : > { %v276_v51 = vpack.c.bf16 %v260_v50, %v259_v49 }
  0x1c   : > { %994 = vmatmul.mubr.msk.bf16.gmra.mrb[4].mxu0 %vm300_vm0, %v264_v17 }
  0x1d   : > { %997 = vmatprep.mubr.msk.bf16.mxu0 %vm300_vm0, %v265_v18 }
  0x24   : > { %998 = vmatmul.mubr.msk.bf16.gmra.mrb[8].mxu0 %vm300_vm0, %v266_v23 }
  0x25   : > { %1001 = vmatprep.mubr.msk.bf16.mxu0 %vm300_vm0, %v267_v24 }
  0x2c   : > { %1002 = vmatmul.mubr.msk.bf16.gmra.mrb[12].mxu0 %vm300_vm0, %v268_v29 }
  0x2d   : > { %1005 = vmatprep.mubr.msk.bf16.mxu0 %vm300_vm0, %v269_v30 }
  0x34   : > { %1006 = vmatmul.mubr.msk.bf16.gmra.mrb[16].mxu0 %vm300_vm0, %v270_v35 }
  0x35   : > { %1009 = vmatprep.mubr.msk.bf16.mxu0 %vm300_vm0, %v271_v36 }
  0x3c   : > { %1010 = vmatmul.mubr.msk.bf16.gmra.mrb[20].mxu0 %vm300_vm0, %v272_v41 }
  0x3d   : > { %1013 = vmatprep.mubr.msk.bf16.mxu0 %vm300_vm0, %v273_v42 }
  0x44   : > { %1014 = vmatmul.mubr.msk.bf16.gmra.mrb[24].mxu0 %vm300_vm0, %v274_v47 }
  0x45   : > { %1017 = vmatprep.mubr.msk.bf16.mxu0 %vm300_vm0, %v275_v48 }
  0x4c   : > { %1018 = vmatmul.mubr.msk.bf16.gmra.mrb[28].mxu0 %vm300_vm0, %v276_v51 }
  0xe7   : > { %v991_v55 = vpop.f32.mrb[0].mxu0 }
  0xe8   : > { %v392_v56 = vadd.f32 %v991_v55, %v1200_v54  ;;  %v383_v57 = vpop.f32.mrb[1].mxu0 }
  0xe9   : > { %v384_v58 = vadd.f32 %v1200_v54, %v383_v57  ;;  %v992_v59 = vpop.f32.mrb[2].mxu0 }
  0xea   : > { %v395_v60 = vadd.f32 %v992_v59, %v1200_v54  ;;  %v386_v61 = vpop.f32.mrb[3].mxu0  ;;  %v512_v63 = vmax.f32 %v392_v56, 0.0 }
  0xeb   : > { %v387_v62 = vadd.f32 %v1200_v54, %v386_v61  ;;  %v510_v1 = vmax.f32 %v384_v58, 0.0 }
  0xec   : > { %v513_v0 = vmax.f32 %v395_v60, 0.0 }
  0xed   : > { %v511_v2 = vmax.f32 %v387_v62, 0.0 }
  0xee   : > { %v543_v3 = vpack.c.bf16 %v513_v0, %v512_v63 }
  0xef   : > { %v995_v4 = vpop.f32.mrb[4].mxu0  ;;  %v542_v5 = vpack.c.bf16 %v511_v2, %v510_v1 }
  0xf0   : > { %v408_v6 = vadd.f32 %v995_v4, %v1200_v54  ;;  %v399_v7 = vpop.f32.mrb[5].mxu0 }
  0xf1   : > { %v400_v8 = vadd.f32 %v1200_v54, %v399_v7  ;;  %v996_v9 = vpop.f32.mrb[6].mxu0  ;;  %1029 = vmatprep.mubr.msk.bf16.mxu1 %vm597_vm1, %v542_v5 }
  0xf2   : > { %v411_v10 = vadd.f32 %v996_v9, %v1200_v54  ;;  %v402_v11 = vpop.f32.mrb[7].mxu0  ;;  %1030 = vmatmul.mubr.msk.bf16.vlgmr.msra.gmra.mrb[0].mxu1 %vm597_vm1, %v543_v3  ;;  %v516_v13 = vmax.f32 %v408_v6, 0.0 }
  0xf3   : > { %v403_v12 = vadd.f32 %v1200_v54, %v402_v11  ;;  %v514_v15 = vmax.f32 %v400_v8, 0.0 }
  0xf4   : > { %v517_v14 = vmax.f32 %v411_v10, 0.0 }
  0xf5   : > { %v515_v16 = vmax.f32 %v403_v12, 0.0 }
  0xf6   : > { %v545_v17 = vpack.c.bf16 %v517_v14, %v516_v13 }
  0xf7   : > { %v544_v18 = vpack.c.bf16 %v515_v16, %v514_v15  ;;  %v999_v19 = vpop.f32.mrb[8].mxu0 }
  0xf8   : > { %v424_v20 = vadd.f32 %v999_v19, %v1200_v54  ;;  %v415_v21 = vpop.f32.mrb[9].mxu0 }
  0xf9   : > { %v416_v22 = vadd.f32 %v1200_v54, %v415_v21  ;;  %v1000_v23 = vpop.f32.mrb[10].mxu0  ;;  %1033 = vmatprep.mubr.msk.bf16.mxu1 %vm597_vm1, %v544_v18 }
  0xfa   : > { %v427_v24 = vadd.f32 %v1000_v23, %v1200_v54  ;;  %v418_v25 = vpop.f32.mrb[11].mxu0  ;;  %1034 = vmatmul.mubr.msk.bf16.gmra.mrb[4].mxu1 %vm597_vm1, %v545_v17  ;;  %v520_v27 = vmax.f32 %v424_v20, 0.0 }
  0xfb   : > { %v419_v26 = vadd.f32 %v1200_v54, %v418_v25  ;;  %v518_v29 = vmax.f32 %v416_v22, 0.0 }
  0xfc   : > { %v521_v28 = vmax.f32 %v427_v24, 0.0 }
  0xfd   : > { %v519_v30 = vmax.f32 %v419_v26, 0.0 }
  0xfe   : > { %v547_v31 = vpack.c.bf16 %v521_v28, %v520_v27 }
  0xff   : > { %v546_v32 = vpack.c.bf16 %v519_v30, %v518_v29  ;;  %v1003_v33 = vpop.f32.mrb[12].mxu0 }
 0x100   : > { %v440_v34 = vadd.f32 %v1003_v33, %v1200_v54  ;;  %v431_v35 = vpop.f32.mrb[13].mxu0 }
 0x101   : > { %v432_v36 = vadd.f32 %v1200_v54, %v431_v35  ;;  %v1004_v37 = vpop.f32.mrb[14].mxu0  ;;  %1037 = vmatprep.mubr.msk.bf16.mxu1 %vm597_vm1, %v546_v32 }
 0x102   : > { %v443_v38 = vadd.f32 %v1004_v37, %v1200_v54  ;;  %v434_v39 = vpop.f32.mrb[15].mxu0  ;;  %1038 = vmatmul.mubr.msk.bf16.gmra.mrb[8].mxu1 %vm597_vm1, %v547_v31  ;;  %v524_v41 = vmax.f32 %v440_v34, 0.0 }
 0x103   : > { %v435_v40 = vadd.f32 %v1200_v54, %v434_v39  ;;  %v522_v43 = vmax.f32 %v432_v36, 0.0 }
 0x104   : > { %v525_v42 = vmax.f32 %v443_v38, 0.0 }
 0x105   : > { %v523_v44 = vmax.f32 %v435_v40, 0.0  ;;  %v1253_v40 = vld [vmem:[%s1365_s4] ss:$0 sm:$0xff] }
 0x106   : > { %v549_v45 = vpack.c.bf16 %v525_v42, %v524_v41 }
 0x107   : > { %v548_v46 = vpack.c.bf16 %v523_v44, %v522_v43  ;;  %v1007_v47 = vpop.f32.mrb[16].mxu0 }
 0x108   : > { %v456_v48 = vadd.f32 %v1007_v47, %v1200_v54  ;;  %v447_v49 = vpop.f32.mrb[17].mxu0 }
 0x109   : > { %v448_v50 = vadd.f32 %v1200_v54, %v447_v49  ;;  %v1008_v51 = vpop.f32.mrb[18].mxu0  ;;  %1041 = vmatprep.mubr.msk.bf16.mxu1 %vm597_vm1, %v548_v46 }
 0x10a   : > { %v459_v52 = vadd.f32 %v1008_v51, %v1200_v54  ;;  %v450_v53 = vpop.f32.mrb[19].mxu0  ;;  %1042 = vmatmul.mubr.msk.bf16.gmra.mrb[12].mxu1 %vm597_vm1, %v549_v45  ;;  %v528_v56 = vmax.f32 %v456_v48, 0.0 }
 0x10b   : > { %v451_v55 = vadd.f32 %v1200_v54, %v450_v53  ;;  %v526_v58 = vmax.f32 %v448_v50, 0.0 }
 0x10c   : > { %v529_v57 = vmax.f32 %v459_v52, 0.0 }
 0x10d   : > { %v527_v59 = vmax.f32 %v451_v55, 0.0 }
 0x10e   : > { %v551_v60 = vpack.c.bf16 %v529_v57, %v528_v56 }
 0x10f   : > { %v550_v61 = vpack.c.bf16 %v527_v59, %v526_v58  ;;  %v1011_v62 = vpop.f32.mrb[20].mxu0 }
 0x110   : > { %v472_v63 = vadd.f32 %v1011_v62, %v1200_v54  ;;  %v463_v0 = vpop.f32.mrb[21].mxu0 }
 0x111   : > { %v464_v1 = vadd.f32 %v1200_v54, %v463_v0  ;;  %v1012_v2 = vpop.f32.mrb[22].mxu0  ;;  %1045 = vmatprep.mubr.msk.bf16.mxu1 %vm597_vm1, %v550_v61 }
 0x112   : > { %v475_v3 = vadd.f32 %v1012_v2, %v1200_v54  ;;  %v466_v4 = vpop.f32.mrb[23].mxu0  ;;  %1046 = vmatmul.mubr.msk.bf16.gmra.mrb[16].mxu1 %vm597_vm1, %v551_v60  ;;  %v532_v6 = vmax.f32 %v472_v63, 0.0 }
 0x113   : > { %v467_v5 = vadd.f32 %v1200_v54, %v466_v4  ;;  %v530_v8 = vmax.f32 %v464_v1, 0.0 }
 0x114   : > { %v533_v7 = vmax.f32 %v475_v3, 0.0 }
 0x115   : > { %v531_v9 = vmax.f32 %v467_v5, 0.0 }
 0x116   : > { %v553_v10 = vpack.c.bf16 %v533_v7, %v532_v6 }
 0x117   : > { %v552_v11 = vpack.c.bf16 %v531_v9, %v530_v8  ;;  %v1015_v12 = vpop.f32.mrb[24].mxu0 }
 0x118   : > { %v488_v13 = vadd.f32 %v1015_v12, %v1200_v54  ;;  %v479_v14 = vpop.f32.mrb[25].mxu0 }
 0x119   : > { %v480_v15 = vadd.f32 %v1200_v54, %v479_v14  ;;  %v1016_v16 = vpop.f32.mrb[26].mxu0  ;;  %1049 = vmatprep.mubr.msk.bf16.mxu1 %vm597_vm1, %v552_v11 }
 0x11a   : > { %v491_v17 = vadd.f32 %v1016_v16, %v1200_v54  ;;  %v482_v18 = vpop.f32.mrb[27].mxu0  ;;  %1050 = vmatmul.mubr.msk.bf16.gmra.mrb[20].mxu1 %vm597_vm1, %v553_v10  ;;  %v536_v20 = vmax.f32 %v488_v13, 0.0 }
 0x11b   : > { %v483_v19 = vadd.f32 %v1200_v54, %v482_v18  ;;  %v534_v22 = vmax.f32 %v480_v15, 0.0 }
 0x11c   : > { %v537_v21 = vmax.f32 %v491_v17, 0.0 }
 0x11d   : > { %v535_v23 = vmax.f32 %v483_v19, 0.0 }
 0x11e   : > { %v555_v24 = vpack.c.bf16 %v537_v21, %v536_v20 }
 0x11f   : > { %v554_v25 = vpack.c.bf16 %v535_v23, %v534_v22  ;;  %v1019_v26 = vpop.f32.mrb[28].mxu0 }
 0x120   : > { %v504_v27 = vadd.f32 %v1019_v26, %v1200_v54  ;;  %v495_v28 = vpop.f32.mrb[29].mxu0 }
 0x121   : > { %v496_v29 = vadd.f32 %v1200_v54, %v495_v28  ;;  %v1020_v30 = vpop.f32.mrb[30].mxu0  ;;  %1053 = vmatprep.mubr.msk.bf16.mxu1 %vm597_vm1, %v554_v25 }
 0x122   : > { %v507_v31 = vadd.f32 %v1020_v30, %v1200_v54  ;;  %v498_v32 = vpop.f32.mrb[31].mxu0  ;;  %1054 = vmatmul.mubr.msk.bf16.gmra.mrb[24].mxu1 %vm597_vm1, %v555_v24  ;;  %v540_v34 = vmax.f32 %v504_v27, 0.0 }
 0x123   : > { %v499_v33 = vadd.f32 %v1200_v54, %v498_v32  ;;  %v538_v36 = vmax.f32 %v496_v29, 0.0 }
 0x124   : > { %v541_v35 = vmax.f32 %v507_v31, 0.0 }
 0x125   : > { %v539_v37 = vmax.f32 %v499_v33, 0.0 }
 0x126   : > { %v557_v38 = vpack.c.bf16 %v541_v35, %v540_v34 }
 0x127   : > { %v556_v39 = vpack.c.bf16 %v539_v37, %v538_v36 }
 0x129   : > { %1057 = vmatprep.mubr.msk.bf16.mxu1 %vm597_vm1, %v556_v39 }
 0x12a   : > { %1058 = vmatmul.mubr.msk.bf16.gmra.mrb[28].mxu1 %vm597_vm1, %v557_v38 }
 0x1c5   : > { %v1031_v54 = vpop.f32.mrb[0].mxu1 }
 0x1c6   : > { %v689_v41 = vadd.f32 %v1031_v54, %v1253_v40  ;;  %v680_v42 = vpop.f32.mrb[1].mxu1 }
 0x1c7   : > { %v681_v43 = vadd.f32 %v1253_v40, %v680_v42  ;;  %v1032_v44 = vpop.f32.mrb[2].mxu1 }
 0x1c8   : > { %810 = vst.msk [vmem:[%s1260_s19 + $0x10] sm:$0xff] %vm807_vm2, %v689_v41  ;;  %v692_v45 = vadd.f32 %v1032_v44, %v1253_v40  ;;  %v683_v46 = vpop.f32.mrb[3].mxu1 }
 0x1c9   : > { %808 = vst.msk [vmem:[%s1260_s19] sm:$0xff] %vm807_vm2, %v681_v43  ;;  %v684_v47 = vadd.f32 %v1253_v40, %v683_v46 }
 0x1ca   : > { %811 = vst.msk [vmem:[%s1260_s19 + $0x18] sm:$0xff] %vm807_vm2, %v692_v45 }
 0x1cb   : > { %809 = vst.msk [vmem:[%s1260_s19 + $0x8] sm:$0xff] %vm807_vm2, %v684_v47 }
 0x1cd   : > { %v1035_v48 = vpop.f32.mrb[4].mxu1 }
 0x1ce   : > { %v705_v49 = vadd.f32 %v1035_v48, %v1253_v40  ;;  %v696_v50 = vpop.f32.mrb[5].mxu1 }
 0x1cf   : > { %v697_v51 = vadd.f32 %v1253_v40, %v696_v50  ;;  %v1036_v52 = vpop.f32.mrb[6].mxu1 }
 0x1d0   : > { %814 = vst.msk [vmem:[%s1260_s19 + $0x30] sm:$0xff] %vm807_vm2, %v705_v49  ;;  %v708_v53 = vadd.f32 %v1036_v52, %v1253_v40  ;;  %v699_v55 = vpop.f32.mrb[7].mxu1 }
 0x1d1   : > { %812 = vst.msk [vmem:[%s1260_s19 + $0x20] sm:$0xff] %vm807_vm2, %v697_v51  ;;  %v700_v56 = vadd.f32 %v1253_v40, %v699_v55 }
 0x1d2   : > { %815 = vst.msk [vmem:[%s1260_s19 + $0x38] sm:$0xff] %vm807_vm2, %v708_v53 }
 0x1d3   : > { %813 = vst.msk [vmem:[%s1260_s19 + $0x28] sm:$0xff] %vm807_vm2, %v700_v56 }
 0x1d5   : > { %v1039_v57 = vpop.f32.mrb[8].mxu1 }
 0x1d6   : > { %v721_v58 = vadd.f32 %v1039_v57, %v1253_v40  ;;  %v712_v59 = vpop.f32.mrb[9].mxu1 }
 0x1d7   : > { %v713_v60 = vadd.f32 %v1253_v40, %v712_v59  ;;  %v1040_v61 = vpop.f32.mrb[10].mxu1 }
 0x1d8   : > { %818 = vst.msk [vmem:[%s1260_s19 + $0x50] sm:$0xff] %vm807_vm2, %v721_v58  ;;  %v724_v62 = vadd.f32 %v1040_v61, %v1253_v40  ;;  %v715_v63 = vpop.f32.mrb[11].mxu1 }
 0x1d9   : > { %816 = vst.msk [vmem:[%s1260_s19 + $0x40] sm:$0xff] %vm807_vm2, %v713_v60  ;;  %v716_v0 = vadd.f32 %v1253_v40, %v715_v63 }
 0x1da   : > { %819 = vst.msk [vmem:[%s1260_s19 + $0x58] sm:$0xff] %vm807_vm2, %v724_v62 }
 0x1db   : > { %817 = vst.msk [vmem:[%s1260_s19 + $0x48] sm:$0xff] %vm807_vm2, %v716_v0 }
 0x1dd   : > { %v1043_v1 = vpop.f32.mrb[12].mxu1 }
 0x1de   : > { %v737_v2 = vadd.f32 %v1043_v1, %v1253_v40  ;;  %v728_v3 = vpop.f32.mrb[13].mxu1 }
 0x1df   : > { %v729_v4 = vadd.f32 %v1253_v40, %v728_v3  ;;  %v1044_v5 = vpop.f32.mrb[14].mxu1 }
 0x1e0   : > { %822 = vst.msk [vmem:[%s1260_s19 + $0x70] sm:$0xff] %vm807_vm2, %v737_v2  ;;  %v740_v6 = vadd.f32 %v1044_v5, %v1253_v40  ;;  %v731_v7 = vpop.f32.mrb[15].mxu1 }
 0x1e1   : > { %820 = vst.msk [vmem:[%s1260_s19 + $0x60] sm:$0xff] %vm807_vm2, %v729_v4  ;;  %v732_v8 = vadd.f32 %v1253_v40, %v731_v7 }
 0x1e2   : > { %823 = vst.msk [vmem:[%s1260_s19 + $0x78] sm:$0xff] %vm807_vm2, %v740_v6 }
 0x1e3   : > { %821 = vst.msk [vmem:[%s1260_s19 + $0x68] sm:$0xff] %vm807_vm2, %v732_v8 }
 0x1e5   : > { %v1047_v9 = vpop.f32.mrb[16].mxu1 }
 0x1e6   : > { %v753_v10 = vadd.f32 %v1047_v9, %v1253_v40  ;;  %v744_v11 = vpop.f32.mrb[17].mxu1 }
 0x1e7   : > { %v745_v12 = vadd.f32 %v1253_v40, %v744_v11  ;;  %v1048_v13 = vpop.f32.mrb[18].mxu1 }
 0x1e8   : > { %826 = vst.msk [vmem:[%s1260_s19 + $0x90] sm:$0xff] %vm807_vm2, %v753_v10  ;;  %v756_v14 = vadd.f32 %v1048_v13, %v1253_v40  ;;  %v747_v15 = vpop.f32.mrb[19].mxu1 }
 0x1e9   : > { %824 = vst.msk [vmem:[%s1260_s19 + $0x80] sm:$0xff] %vm807_vm2, %v745_v12  ;;  %v748_v16 = vadd.f32 %v1253_v40, %v747_v15 }
 0x1ea   : > { %827 = vst.msk [vmem:[%s1260_s19 + $0x98] sm:$0xff] %vm807_vm2, %v756_v14 }
 0x1eb   : > { %825 = vst.msk [vmem:[%s1260_s19 + $0x88] sm:$0xff] %vm807_vm2, %v748_v16 }
 0x1ed   : > { %v1051_v17 = vpop.f32.mrb[20].mxu1 }
 0x1ee   : > { %v769_v18 = vadd.f32 %v1051_v17, %v1253_v40  ;;  %v760_v19 = vpop.f32.mrb[21].mxu1 }
 0x1ef   : > { %v761_v20 = vadd.f32 %v1253_v40, %v760_v19  ;;  %v1052_v21 = vpop.f32.mrb[22].mxu1 }
 0x1f0   : > { %830 = vst.msk [vmem:[%s1260_s19 + $0xb0] sm:$0xff] %vm807_vm2, %v769_v18  ;;  %v772_v22 = vadd.f32 %v1052_v21, %v1253_v40  ;;  %v763_v23 = vpop.f32.mrb[23].mxu1 }
 0x1f1   : > { %828 = vst.msk [vmem:[%s1260_s19 + $0xa0] sm:$0xff] %vm807_vm2, %v761_v20  ;;  %v764_v24 = vadd.f32 %v1253_v40, %v763_v23 }
 0x1f2   : > { %831 = vst.msk [vmem:[%s1260_s19 + $0xb8] sm:$0xff] %vm807_vm2, %v772_v22 }
 0x1f3   : > { %829 = vst.msk [vmem:[%s1260_s19 + $0xa8] sm:$0xff] %vm807_vm2, %v764_v24 }
 0x1f5   : > { %v1055_v25 = vpop.f32.mrb[24].mxu1 }
 0x1f6   : > { %v785_v26 = vadd.f32 %v1055_v25, %v1253_v40  ;;  %v776_v27 = vpop.f32.mrb[25].mxu1 }
 0x1f7   : > { %v777_v28 = vadd.f32 %v1253_v40, %v776_v27  ;;  %v1056_v29 = vpop.f32.mrb[26].mxu1 }
 0x1f8   : > { %834 = vst.msk [vmem:[%s1260_s19 + $0xd0] sm:$0xff] %vm807_vm2, %v785_v26  ;;  %v788_v30 = vadd.f32 %v1056_v29, %v1253_v40  ;;  %v779_v31 = vpop.f32.mrb[27].mxu1 }
 0x1f9   : > { %832 = vst.msk [vmem:[%s1260_s19 + $0xc0] sm:$0xff] %vm807_vm2, %v777_v28  ;;  %v780_v32 = vadd.f32 %v1253_v40, %v779_v31 }
 0x1fa   : > { %835 = vst.msk [vmem:[%s1260_s19 + $0xd8] sm:$0xff] %vm807_vm2, %v788_v30 }
 0x1fb   : > { %833 = vst.msk [vmem:[%s1260_s19 + $0xc8] sm:$0xff] %vm807_vm2, %v780_v32 }
 0x1fd   : > { %v1059_v33 = vpop.f32.mrb[28].mxu1 }
 0x1fe   : > { %v801_v34 = vadd.f32 %v1059_v33, %v1253_v40  ;;  %v792_v35 = vpop.f32.mrb[29].mxu1 }
 0x1ff   : > { %v793_v36 = vadd.f32 %v1253_v40, %v792_v35  ;;  %v1060_v37 = vpop.f32.mrb[30].mxu1 }
 0x200   : > { %838 = vst.msk [vmem:[%s1260_s19 + $0xf0] sm:$0xff] %vm807_vm2, %v801_v34  ;;  %v804_v38 = vadd.f32 %v1060_v37, %v1253_v40  ;;  %v795_v39 = vpop.f32.mrb[31].mxu1 }
 0x201   : > { %836 = vst.msk [vmem:[%s1260_s19 + $0xe0] sm:$0xff] %vm807_vm2, %v793_v36  ;;  %v796_v54 = vadd.f32 %v1253_v40, %v795_v39 }
 0x202   : > { %839 = vst.msk [vmem:[%s1260_s19 + $0xf8] sm:$0xff] %vm807_vm2, %v804_v38 }
 0x203   : > { %837 = vst.msk [vmem:[%s1260_s19 + $0xe8] sm:$0xff] %vm807_vm2, %v796_v54 }
 0x204 PF: > { %s15_s18 = sadd.s32 1, %s1081_s18  }
 0x205   : > { %p12_p4 = scmp.ge.s32.totalorder %s15_s18, 4  }
 0x207   :  { %14 = sbr.rel (!%p12_p4) target bundleno = 1 (0x1), region = 70 }

</bundles_post_ra>
